<compile_context>
chip_gen: v7x
topology: tpu7x:2x2x1
jax: 0.10.0
libtpu: 0.0.40
codegen_flags: <defaults>
</compile_context>

<pallas_src>
import functools
import math

import jax
import jax.numpy as jnp
import numpy as np
from jax import lax
from jax.experimental import pallas as pl
from jax.experimental.pallas import tpu as pltpu


def _layernorm(x, gamma, beta, eps=1e-5):
    mu = jnp.mean(x, axis=-1, keepdims=True)
    var = jnp.mean((x - mu) ** 2, axis=-1, keepdims=True)
    return (x - mu) * lax.rsqrt(var + eps) * gamma + beta


def _decoder_stack_kernel(q_ref, v_ref,
                          wq_ref, wkv_ref, wo_ref, w1_ref, w2_ref,
                          vec_ref, bf1_ref,
                          out_ref,
                          *, num_heads, resident):
    l = pl.program_id(2)

    # Initialize the carry (held in the VMEM-resident output block) with the
    # original query on the first layer step of this (b, i) tile.
    @pl.when(l == 0)
    def _():
        out_ref[0] = q_ref[0]

    # Per-layer weights: resident -> dynamic index along the stacked L axis
    # (DMA'd once, stays in VMEM); streamed -> block index already selects l.
    idx = l if resident else 0
    wq = wq_ref[idx]      # [D, D]   bf16 (1/sqrt(dh) folded in)
    wkv = wkv_ref[idx]    # [D, 2D]  bf16 (Wk | Wv)
    wo = wo_ref[idx]      # [D, D]   bf16
    w1 = w1_ref[idx]      # [D, Dff] bf16
    w2 = w2_ref[idx]      # [Dff, D] bf16
    vecs = vec_ref[idx]   # [16, D]  f32 packed bias / LN vectors
    bf1 = bf1_ref[idx]    # [1, Dff] f32

    bq, bk, bv, bo = vecs[0:1], vecs[1:2], vecs[2:3], vecs[3:4]
    g1, be1 = vecs[4:5], vecs[5:6]
    bf2 = vecs[6:7]
    g2, be2 = vecs[7:8], vecs[8:9]

    q = out_ref[0]        # [tq, D] f32 running query
    v_bf = v_ref[0]       # [Sv, D] bf16 (pre-cast in the wrapper)

    D = q.shape[-1]
    dh = D // num_heads
    bf16 = jnp.bfloat16

    # Projections: bf16 operands on the MXU, f32 accumulation.  K|V fused.
    Q = jnp.dot(q.astype(bf16), wq, preferred_element_type=jnp.float32) + bq
    KV = (jnp.dot(v_bf, wkv, preferred_element_type=jnp.float32)
          + jnp.concatenate([bk, bv], axis=-1))
    Qb = Q.astype(bf16)       # [tq, D]
    KVb = KV.astype(bf16)     # [Sv, 2D]

    # Per-head attention; head outputs concatenated lane-dense, then ONE Wo
    # matmul with K=D contraction (fills the MXU).
    heads = []
    for h in range(num_heads):
        sl = slice(h * dh, (h + 1) * dh)
        Qh = Qb[:, sl]                                  # [tq, dh]
        Kh = KVb[:, sl]                                 # [Sv, dh]
        Vh = KVb[:, D + h * dh: D + (h + 1) * dh]       # [Sv, dh]

        s = lax.dot_general(Qh, Kh, (((1,), (1,)), ((), ())),
                            preferred_element_type=jnp.float32)  # scaled (Wq)
        s = s - jnp.max(s, axis=-1, keepdims=True)
        p = jnp.exp(s)
        p = p * pl.reciprocal(jnp.sum(p, axis=-1, keepdims=True), approx=True)
        heads.append(jnp.dot(p.astype(bf16), Vh,
                             preferred_element_type=jnp.float32).astype(bf16))

    o = jnp.concatenate(heads, axis=-1)                 # [tq, D] bf16
    attn = jnp.dot(o, wo, preferred_element_type=jnp.float32) + bo

    # Residual + LayerNorm 1 (f32 vector math).
    x = _layernorm(q + attn, g1, be1)

    # FFN: D -> Dff -> D with ReLU, bf16 MXU operands.
    h1 = jnp.dot(x.astype(bf16), w1, preferred_element_type=jnp.float32) + bf1
    h1 = jnp.maximum(h1, 0.0)
    h2 = jnp.dot(h1.astype(bf16), w2, preferred_element_type=jnp.float32) + bf2

    # Residual + LayerNorm 2; carry into the next layer step.
    out_ref[0] = _layernorm(x + h2, g2, be2)


def _stack_params(layer_params, num_heads):
    """Stack per-layer params on a leading L axis, cast matmul weights to bf16,
    fuse Wk|Wv, fold the 1/sqrt(dh) scale into Wq/bq, and pack all small
    bias / LayerNorm vectors into one [L, 16, D] ref (plus [L, 1, Dff])."""
    bf16 = jnp.bfloat16
    D = layer_params[0]["wq"].shape[0]
    dh = D // num_heads
    scale = 1.0 / math.sqrt(dh)

    wq = jnp.stack([p["wq"] * scale for p in layer_params]).astype(bf16)
    wkv = jnp.stack([jnp.concatenate([p["wk"], p["wv"]], axis=1)
                     for p in layer_params]).astype(bf16)
    wo = jnp.stack([p["wo"] for p in layer_params]).astype(bf16)
    w1 = jnp.stack([p["w1"] for p in layer_params]).astype(bf16)
    w2 = jnp.stack([p["w2"] for p in layer_params]).astype(bf16)

    def rows(p):
        r = jnp.concatenate([
            p["bq"] * scale, p["bk"], p["bv"], p["bo"],
            p["g1"], p["be1"], p["bf2"], p["g2"], p["be2"],
        ], axis=0)                                        # [9, D]
        pad = (-r.shape[0]) % 8
        if pad:
            r = jnp.concatenate([r, jnp.zeros((pad, D), r.dtype)], axis=0)
        return r

    vecs = jnp.stack([rows(p) for p in layer_params])     # [L, 16, D] f32
    bf1 = jnp.stack([p["bf1"] for p in layer_params])     # [L, 1, Dff] f32
    return dict(wq=wq, wkv=wkv, wo=wo, w1=w1, w2=w2, vecs=vecs, bf1=bf1)


def _vmem_capacity_bytes():
    try:
        cap = getattr(pltpu.get_tpu_info(), "vmem_capacity_bytes", None)
        if cap:
            return int(cap)
    except Exception:
        pass
    return 64 * 1024 * 1024   # conservative (v7x per-TC)


def decoder_forward(q, v, layer_params, num_heads, *, q_tile=None):
    """Decoder.forward: q = layer(q, v) for each layer, as one fused kernel."""
    B, Sq, D = q.shape
    _, Sv, _ = v.shape
    L = len(layer_params)
    Dff = layer_params[0]["w1"].shape[1]
    assert D % num_heads == 0, "dim must be divisible by num_heads"

    # Generation-aware VMEM budget (don't hardcode a 128-MiB-chip number).
    vmem_cap = _vmem_capacity_bytes()
    vmem_limit = max(32 << 20, min(int(vmem_cap * 0.85), vmem_cap - (8 << 20)))

    # q tile: 256 fills the 256-wide MXU (v6e/v7x) but only when VMEM allows.
    if q_tile is None:
        if Sq <= 256:
            q_tile = Sq
        elif Sq % 256 == 0 and vmem_cap >= (96 << 20):
            q_tile = 256
        elif Sq % 128 == 0:
            q_tile = 128
        else:
            q_tile = Sq
    assert Sq % q_tile == 0
    nq = Sq // q_tile

    sp = _stack_params(layer_params, num_heads)
    NV = sp["vecs"].shape[1]

    # Decide weight residency: full-L resident (DMA'd once) vs per-layer stream.
    per_layer_w = (4 * D * D + 2 * D * Dff) * 2 + (NV * D + Dff) * 4
    act_bytes = (4 * q_tile * D * 4            # q-in + out blocks (double-buf)
                 + 2 * Sv * D * 2              # bf16 v block (double-buf)
                 + 4 * q_tile * D * 4          # Q / attn / x / y f32 temps
                 + 2 * Sv * 2 * D * 4          # KV f32 + bf16
                 + 2 * q_tile * Dff * 4        # h1 f32 + bf16
                 + 2 * q_tile * Sv * 4)        # score temps
    resident = (L * per_layer_w + act_bytes + (4 << 20)) <= vmem_limit

    if resident:
        def wspec(shape):
            return pl.BlockSpec((L,) + shape, lambda b, i, l: (0, 0, 0))
    else:
        def wspec(shape):
            return pl.BlockSpec((1,) + shape, lambda b, i, l: (l, 0, 0))

    in_specs = [
        pl.BlockSpec((1, q_tile, D), lambda b, i, l: (b, i, 0)),   # q (l==0 only)
        pl.BlockSpec((1, Sv, D), lambda b, i, l: (b, 0, 0)),       # v bf16, resident over i,l
        wspec((D, D)),            # Wq (scale folded)
        wspec((D, 2 * D)),        # Wk|Wv
        wspec((D, D)),            # Wo
        wspec((D, Dff)),          # W1
        wspec((Dff, D)),          # W2
        wspec((NV, D)),           # packed biases / LN vectors
        wspec((1, Dff)),          # b1
    ]
    out_spec = pl.BlockSpec((1, q_tile, D), lambda b, i, l: (b, i, 0))

    kernel = functools.partial(_decoder_stack_kernel,
                               num_heads=num_heads, resident=resident)
    return pl.pallas_call(
        kernel,
        out_shape=jax.ShapeDtypeStruct((B, Sq, D), jnp.float32),
        grid_spec=pltpu.PrefetchScalarGridSpec(
            num_scalar_prefetch=0,
            grid=(B, nq, L),
            in_specs=in_specs,
            out_specs=out_spec,
        ),
        compiler_params=pltpu.CompilerParams(
            dimension_semantics=("parallel", "parallel", "arbitrary"),
            vmem_limit_bytes=vmem_limit,
        ),
    )(q, v.astype(jnp.bfloat16),
      sp["wq"], sp["wkv"], sp["wo"], sp["w1"], sp["w2"],
      sp["vecs"], sp["bf1"])


# ---------------- pure-JAX reference (mirrors the bf16-operand policy) -------
def _block_ref(q, v, p, num_heads):
    B, Sq, D = q.shape
    dh = D // num_heads
    bf16, f32 = jnp.bfloat16, jnp.float32

    def mm(a, w):
        return jnp.dot(a.astype(bf16), w.astype(bf16), preferred_element_type=f32)

    Q = mm(q, p["wq"]) + p["bq"]
    K = mm(v, p["wk"]) + p["bk"]
    V = mm(v, p["wv"]) + p["bv"]

    def split(x):
        return x.reshape(B, -1, num_heads, dh).transpose(0, 2, 1, 3)

    Qh, Kh, Vh = split(Q), split(K), split(V)
    s = jnp.einsum("bhqd,bhkd->bhqk", Qh.astype(bf16), Kh.astype(bf16),
                   preferred_element_type=f32) / np.sqrt(dh)
    a = jax.nn.softmax(s, axis=-1)
    o = jnp.einsum("bhqk,bhkd->bhqd", a.astype(bf16), Vh.astype(bf16),
                   preferred_element_type=f32)
    o = o.transpose(0, 2, 1, 3).reshape(B, Sq, D)
    o = mm(o, p["wo"]) + p["bo"]

    def ln(x, g, b):
        mu = x.mean(-1, keepdims=True)
        var = ((x - mu) ** 2).mean(-1, keepdims=True)
        return (x - mu) / jnp.sqrt(var + 1e-5) * g + b

    x = ln(q + o, p["g1"], p["be1"])
    h = jnp.maximum(mm(x, p["w1"]) + p["bf1"], 0.0)
    h = mm(h, p["w2"]) + p["bf2"]
    return ln(x + h, p["g2"], p["be2"])


def _decoder_ref(q, v, layer_params, num_heads):
    for p in layer_params:
        q = _block_ref(q, v, p, num_heads)
    return q


# ------------------------------- setup ---------------------------------------
def init_layer_params(key, dim, dff):
    ks = jax.random.split(key, 12)
    s = 0.05

    def w(k, shape):
        return jax.random.normal(k, shape, jnp.float32) * s

    return {
        "wq": w(ks[0], (dim, dim)),  "bq": w(ks[1], (1, dim)),
        "wk": w(ks[2], (dim, dim)),  "bk": w(ks[3], (1, dim)),
        "wv": w(ks[4], (dim, dim)),  "bv": w(ks[5], (1, dim)),
        "wo": w(ks[6], (dim, dim)),  "bo": w(ks[7], (1, dim)),
        "g1": jnp.ones((1, dim), jnp.float32),
        "be1": jnp.zeros((1, dim), jnp.float32),
        "w1": w(ks[8], (dim, dff)),  "bf1": w(ks[9], (1, dff)),
        "w2": w(ks[10], (dff, dim)), "bf2": w(ks[11], (1, dim)),
        "g2": jnp.ones((1, dim), jnp.float32),
        "be2": jnp.zeros((1, dim), jnp.float32),
    }


if __name__ == "__main__":
    B, Sq, Sv, D, H, L = 2, 8, 8, 32, 4, 2   # dim=32, num_heads=4, num_layers=2
    DFF = 4 * D

    key = jax.random.PRNGKey(0)
    kq, kv, kp = jax.random.split(key, 3)
    q = jax.random.normal(kq, (B, Sq, D), jnp.float32)
    v = jax.random.normal(kv, (B, Sv, D), jnp.float32)
    layer_params = [init_layer_params(k, D, DFF)
                    for k in jax.random.split(kp, L)]

    out = jax.block_until_ready(decoder_forward(q, v, layer_params, H))
    ref = jax.block_until_ready(_decoder_ref(q, v, layer_params, H))

    np.testing.assert_allclose(np.asarray(out), np.asarray(ref),
                               rtol=2e-2, atol=2e-2)
    print("KERNEL_OK")
</pallas_src>

<mosaic_0001>
module attributes {stable_mosaic.version = 11 : i64} {
  func.func @_decoder_stack_kernel(%arg0: i32, %arg1: i32, %arg2: i32, %arg3: memref<1x8x32xf32, #tpu.memory_space<vmem>>, %arg4: memref<1x8x32xbf16, #tpu.memory_space<vmem>>, %arg5: memref<2x32x32xbf16, #tpu.memory_space<vmem>>, %arg6: memref<2x32x64xbf16, #tpu.memory_space<vmem>>, %arg7: memref<2x32x32xbf16, #tpu.memory_space<vmem>>, %arg8: memref<2x32x128xbf16, #tpu.memory_space<vmem>>, %arg9: memref<2x128x32xbf16, #tpu.memory_space<vmem>>, %arg10: memref<2x16x32xf32, #tpu.memory_space<vmem>>, %arg11: memref<2x1x128xf32, #tpu.memory_space<vmem>>, %arg12: memref<1x8x32xf32, #tpu.memory_space<vmem>>) attributes {dimension_semantics = [#tpu.dimension_semantics<parallel>, #tpu.dimension_semantics<parallel>, #tpu.dimension_semantics<arbitrary>], iteration_bounds = array<i64: 2, 1, 2>, scalar_prefetch = 0 : i64, scratch_operands = 0 : i64, tpu.core_type = #tpu.core_type<tc>, window_params = [{transform_indices = @transform_0, window_bounds = array<i64: 1, 8, 32>}, {transform_indices = @transform_1, window_bounds = array<i64: 1, 8, 32>}, {pipeline_mode = #tpu.pipeline_mode<synchronous>, transform_indices = @transform_2, window_bounds = array<i64: 2, 32, 32>}, {pipeline_mode = #tpu.pipeline_mode<synchronous>, transform_indices = @transform_3, window_bounds = array<i64: 2, 32, 64>}, {pipeline_mode = #tpu.pipeline_mode<synchronous>, transform_indices = @transform_4, window_bounds = array<i64: 2, 32, 32>}, {pipeline_mode = #tpu.pipeline_mode<synchronous>, transform_indices = @transform_5, window_bounds = array<i64: 2, 32, 128>}, {pipeline_mode = #tpu.pipeline_mode<synchronous>, transform_indices = @transform_6, window_bounds = array<i64: 2, 128, 32>}, {pipeline_mode = #tpu.pipeline_mode<synchronous>, transform_indices = @transform_7, window_bounds = array<i64: 2, 16, 32>}, {pipeline_mode = #tpu.pipeline_mode<synchronous>, transform_indices = @transform_8, window_bounds = array<i64: 2, 1, 128>}, {transform_indices = @transform_9, window_bounds = array<i64: 1, 8, 32>}]} {
    %c0_i32 = arith.constant 0 : i32
    %0 = arith.cmpi eq, %arg2, %c0_i32 : i32
    %1 = arith.extui %0 : i1 to i32
    %c0_i32_0 = arith.constant 0 : i32
    %2 = arith.cmpi ne, %1, %c0_i32_0 : i32
    scf.if %2 {
      %c0_54 = arith.constant 0 : index
      %c0_55 = arith.constant 0 : index
      %c0_56 = arith.constant 0 : index
      %178 = vector.load %arg3[%c0_54, %c0_55, %c0_56] : memref<1x8x32xf32, #tpu.memory_space<vmem>>, vector<1x8x32xf32>
      %179 = vector.shape_cast %178 : vector<1x8x32xf32> to vector<8x32xf32>
      %c0_57 = arith.constant 0 : index
      %c0_58 = arith.constant 0 : index
      %c0_59 = arith.constant 0 : index
      %180 = vector.load %arg12[%c0_57, %c0_58, %c0_59] : memref<1x8x32xf32, #tpu.memory_space<vmem>>, vector<1x8x32xf32>
      %181 = vector.shape_cast %180 : vector<1x8x32xf32> to vector<8x32xf32>
      %182 = vector.shape_cast %179 : vector<8x32xf32> to vector<1x8x32xf32>
      tpu.vector_store %arg12[%c0_57, %c0_58, %c0_59], %182 {strides = array<i32>} : memref<1x8x32xf32, #tpu.memory_space<vmem>>, vector<1x8x32xf32>,
    } else {
    }
    %3 = arith.index_cast %arg2 : i32 to index
    %c0 = arith.constant 0 : index
    %c0_1 = arith.constant 0 : index
    %4 = vector.load %arg5[%3, %c0, %c0_1] : memref<2x32x32xbf16, #tpu.memory_space<vmem>>, vector<1x32x32xbf16>
    %5 = vector.shape_cast %4 : vector<1x32x32xbf16> to vector<32x32xbf16>
    %6 = arith.index_cast %arg2 : i32 to index
    %c0_2 = arith.constant 0 : index
    %c0_3 = arith.constant 0 : index
    %7 = vector.load %arg6[%6, %c0_2, %c0_3] : memref<2x32x64xbf16, #tpu.memory_space<vmem>>, vector<1x32x64xbf16>
    %8 = vector.shape_cast %7 : vector<1x32x64xbf16> to vector<32x64xbf16>
    %9 = arith.index_cast %arg2 : i32 to index
    %c0_4 = arith.constant 0 : index
    %c0_5 = arith.constant 0 : index
    %10 = vector.load %arg7[%9, %c0_4, %c0_5] : memref<2x32x32xbf16, #tpu.memory_space<vmem>>, vector<1x32x32xbf16>
    %11 = vector.shape_cast %10 : vector<1x32x32xbf16> to vector<32x32xbf16>
    %12 = arith.index_cast %arg2 : i32 to index
    %c0_6 = arith.constant 0 : index
    %c0_7 = arith.constant 0 : index
    %13 = vector.load %arg8[%12, %c0_6, %c0_7] : memref<2x32x128xbf16, #tpu.memory_space<vmem>>, vector<1x32x128xbf16>
    %14 = vector.shape_cast %13 : vector<1x32x128xbf16> to vector<32x128xbf16>
    %15 = arith.index_cast %arg2 : i32 to index
    %c0_8 = arith.constant 0 : index
    %c0_9 = arith.constant 0 : index
    %16 = vector.load %arg9[%15, %c0_8, %c0_9] : memref<2x128x32xbf16, #tpu.memory_space<vmem>>, vector<1x128x32xbf16>
    %17 = vector.shape_cast %16 : vector<1x128x32xbf16> to vector<128x32xbf16>
    %18 = arith.index_cast %arg2 : i32 to index
    %c0_10 = arith.constant 0 : index
    %c0_11 = arith.constant 0 : index
    %19 = vector.load %arg10[%18, %c0_10, %c0_11] : memref<2x16x32xf32, #tpu.memory_space<vmem>>, vector<1x16x32xf32>
    %20 = vector.shape_cast %19 : vector<1x16x32xf32> to vector<16x32xf32>
    %21 = arith.index_cast %arg2 : i32 to index
    %c0_12 = arith.constant 0 : index
    %c0_13 = arith.constant 0 : index
    %22 = vector.load %arg11[%21, %c0_12, %c0_13] : memref<2x1x128xf32, #tpu.memory_space<vmem>>, vector<1x1x128xf32>
    %23 = vector.shape_cast %22 : vector<1x1x128xf32> to vector<1x128xf32>
    %24 = vector.extract_strided_slice %20 {offsets = [0, 0], sizes = [1, 32], strides = [1, 1]} : vector<16x32xf32> to vector<1x32xf32>
    %25 = vector.extract_strided_slice %20 {offsets = [1, 0], sizes = [1, 32], strides = [1, 1]} : vector<16x32xf32> to vector<1x32xf32>
    %26 = vector.extract_strided_slice %20 {offsets = [2, 0], sizes = [1, 32], strides = [1, 1]} : vector<16x32xf32> to vector<1x32xf32>
    %27 = vector.extract_strided_slice %20 {offsets = [3, 0], sizes = [1, 32], strides = [1, 1]} : vector<16x32xf32> to vector<1x32xf32>
    %28 = vector.extract_strided_slice %20 {offsets = [4, 0], sizes = [1, 32], strides = [1, 1]} : vector<16x32xf32> to vector<1x32xf32>
    %29 = vector.extract_strided_slice %20 {offsets = [5, 0], sizes = [1, 32], strides = [1, 1]} : vector<16x32xf32> to vector<1x32xf32>
    %30 = vector.extract_strided_slice %20 {offsets = [6, 0], sizes = [1, 32], strides = [1, 1]} : vector<16x32xf32> to vector<1x32xf32>
    %31 = vector.extract_strided_slice %20 {offsets = [7, 0], sizes = [1, 32], strides = [1, 1]} : vector<16x32xf32> to vector<1x32xf32>
    %32 = vector.extract_strided_slice %20 {offsets = [8, 0], sizes = [1, 32], strides = [1, 1]} : vector<16x32xf32> to vector<1x32xf32>
    %c0_14 = arith.constant 0 : index
    %c0_15 = arith.constant 0 : index
    %c0_16 = arith.constant 0 : index
    %33 = vector.load %arg12[%c0_14, %c0_15, %c0_16] : memref<1x8x32xf32, #tpu.memory_space<vmem>>, vector<1x8x32xf32>
    %34 = vector.shape_cast %33 : vector<1x8x32xf32> to vector<8x32xf32>
    %c0_17 = arith.constant 0 : index
    %c0_18 = arith.constant 0 : index
    %c0_19 = arith.constant 0 : index
    %35 = vector.load %arg4[%c0_17, %c0_18, %c0_19] : memref<1x8x32xbf16, #tpu.memory_space<vmem>>, vector<1x8x32xbf16>
    %36 = vector.shape_cast %35 : vector<1x8x32xbf16> to vector<8x32xbf16>
    %37 = arith.truncf %34 : vector<8x32xf32> to vector<8x32xbf16>
    %cst = arith.constant dense<0.000000e+00> : vector<8x32xf32>
    %38 = tpu.matmul %37, %5, %cst {dimension_numbers = #tpu.dot_dimension_numbers<[1], [0], [0], [1], [0, 0, 1, 1], [], []>} : vector<8x32xbf16>, vector<32x32xbf16>, vector<8x32xf32> -> vector<8x32xf32>
    %39 = vector.broadcast %24 : vector<1x32xf32> to vector<8x32xf32>
    %40 = arith.addf %38, %39 : vector<8x32xf32>
    %cst_20 = arith.constant dense<0.000000e+00> : vector<8x64xf32>
    %41 = tpu.matmul %36, %8, %cst_20 {dimension_numbers = #tpu.dot_dimension_numbers<[1], [0], [0], [1], [0, 0, 1, 1], [], []>} : vector<8x32xbf16>, vector<32x64xbf16>, vector<8x64xf32> -> vector<8x64xf32>
    %42 = tpu.concatenate %25, %26 in 1 : vector<1x32xf32>, vector<1x32xf32> -> vector<1x64xf32>
    %43 = vector.broadcast %42 : vector<1x64xf32> to vector<8x64xf32>
    %44 = arith.addf %41, %43 : vector<8x64xf32>
    %45 = arith.truncf %40 : vector<8x32xf32> to vector<8x32xbf16>
    %46 = arith.truncf %44 : vector<8x64xf32> to vector<8x64xbf16>
    %47 = vector.extract_strided_slice %45 {offsets = [0, 0], sizes = [8, 8], strides = [1, 1]} : vector<8x32xbf16> to vector<8x8xbf16>
    %48 = vector.extract_strided_slice %46 {offsets = [0, 0], sizes = [8, 8], strides = [1, 1]} : vector<8x64xbf16> to vector<8x8xbf16>
    %49 = vector.extract_strided_slice %46 {offsets = [0, 32], sizes = [8, 8], strides = [1, 1]} : vector<8x64xbf16> to vector<8x8xbf16>
    %cst_21 = arith.constant dense<0.000000e+00> : vector<8x8xf32>
    %50 = tpu.matmul %47, %48, %cst_21 {dimension_numbers = #tpu.dot_dimension_numbers<[1], [1], [0], [0], [0, 0, 1, 0], [], []>} : vector<8x8xbf16>, vector<8x8xbf16>, vector<8x8xf32> -> vector<8x8xf32>
    %cst_22 = arith.constant dense<0xFF800000> : vector<8xf32>
    %51 = vector.multi_reduction <maximumf>, %50, %cst_22 [1] : vector<8x8xf32> to vector<8xf32>
    %52 = vector.shape_cast %51 : vector<8xf32> to vector<8x1xf32>
    %53 = vector.broadcast %52 : vector<8x1xf32> to vector<8x8xf32>
    %54 = arith.subf %50, %53 : vector<8x8xf32>
    %55 = math.exp %54 : vector<8x8xf32>
    %cst_23 = arith.constant dense<0.000000e+00> : vector<8xf32>
    %56 = vector.multi_reduction <add>, %55, %cst_23 [1] : vector<8x8xf32> to vector<8xf32>
    %57 = vector.shape_cast %56 : vector<8xf32> to vector<8x1xf32>
    %58 = tpu.reciprocal %57 {approx = true} : vector<8x1xf32> -> vector<8x1xf32>
    %59 = vector.broadcast %58 : vector<8x1xf32> to vector<8x8xf32>
    %60 = arith.mulf %55, %59 : vector<8x8xf32>
    %61 = arith.truncf %60 : vector<8x8xf32> to vector<8x8xbf16>
    %cst_24 = arith.constant dense<0.000000e+00> : vector<8x8xf32>
    %62 = tpu.matmul %61, %49, %cst_24 {dimension_numbers = #tpu.dot_dimension_numbers<[1], [0], [0], [1], [0, 0, 1, 1], [], []>} : vector<8x8xbf16>, vector<8x8xbf16>, vector<8x8xf32> -> vector<8x8xf32>
    %63 = arith.truncf %62 : vector<8x8xf32> to vector<8x8xbf16>
    %64 = vector.extract_strided_slice %45 {offsets = [0, 8], sizes = [8, 8], strides = [1, 1]} : vector<8x32xbf16> to vector<8x8xbf16>
    %65 = vector.extract_strided_slice %46 {offsets = [0, 8], sizes = [8, 8], strides = [1, 1]} : vector<8x64xbf16> to vector<8x8xbf16>
    %66 = vector.extract_strided_slice %46 {offsets = [0, 40], sizes = [8, 8], strides = [1, 1]} : vector<8x64xbf16> to vector<8x8xbf16>
    %cst_25 = arith.constant dense<0.000000e+00> : vector<8x8xf32>
    %67 = tpu.matmul %64, %65, %cst_25 {dimension_numbers = #tpu.dot_dimension_numbers<[1], [1], [0], [0], [0, 0, 1, 0], [], []>} : vector<8x8xbf16>, vector<8x8xbf16>, vector<8x8xf32> -> vector<8x8xf32>
    %cst_26 = arith.constant dense<0xFF800000> : vector<8xf32>
    %68 = vector.multi_reduction <maximumf>, %67, %cst_26 [1] : vector<8x8xf32> to vector<8xf32>
    %69 = vector.shape_cast %68 : vector<8xf32> to vector<8x1xf32>
    %70 = vector.broadcast %69 : vector<8x1xf32> to vector<8x8xf32>
    %71 = arith.subf %67, %70 : vector<8x8xf32>
    %72 = math.exp %71 : vector<8x8xf32>
    %cst_27 = arith.constant dense<0.000000e+00> : vector<8xf32>
    %73 = vector.multi_reduction <add>, %72, %cst_27 [1] : vector<8x8xf32> to vector<8xf32>
    %74 = vector.shape_cast %73 : vector<8xf32> to vector<8x1xf32>
    %75 = tpu.reciprocal %74 {approx = true} : vector<8x1xf32> -> vector<8x1xf32>
    %76 = vector.broadcast %75 : vector<8x1xf32> to vector<8x8xf32>
    %77 = arith.mulf %72, %76 : vector<8x8xf32>
    %78 = arith.truncf %77 : vector<8x8xf32> to vector<8x8xbf16>
    %cst_28 = arith.constant dense<0.000000e+00> : vector<8x8xf32>
    %79 = tpu.matmul %78, %66, %cst_28 {dimension_numbers = #tpu.dot_dimension_numbers<[1], [0], [0], [1], [0, 0, 1, 1], [], []>} : vector<8x8xbf16>, vector<8x8xbf16>, vector<8x8xf32> -> vector<8x8xf32>
    %80 = arith.truncf %79 : vector<8x8xf32> to vector<8x8xbf16>
    %81 = vector.extract_strided_slice %45 {offsets = [0, 16], sizes = [8, 8], strides = [1, 1]} : vector<8x32xbf16> to vector<8x8xbf16>
    %82 = vector.extract_strided_slice %46 {offsets = [0, 16], sizes = [8, 8], strides = [1, 1]} : vector<8x64xbf16> to vector<8x8xbf16>
    %83 = vector.extract_strided_slice %46 {offsets = [0, 48], sizes = [8, 8], strides = [1, 1]} : vector<8x64xbf16> to vector<8x8xbf16>
    %cst_29 = arith.constant dense<0.000000e+00> : vector<8x8xf32>
    %84 = tpu.matmul %81, %82, %cst_29 {dimension_numbers = #tpu.dot_dimension_numbers<[1], [1], [0], [0], [0, 0, 1, 0], [], []>} : vector<8x8xbf16>, vector<8x8xbf16>, vector<8x8xf32> -> vector<8x8xf32>
    %cst_30 = arith.constant dense<0xFF800000> : vector<8xf32>
    %85 = vector.multi_reduction <maximumf>, %84, %cst_30 [1] : vector<8x8xf32> to vector<8xf32>
    %86 = vector.shape_cast %85 : vector<8xf32> to vector<8x1xf32>
    %87 = vector.broadcast %86 : vector<8x1xf32> to vector<8x8xf32>
    %88 = arith.subf %84, %87 : vector<8x8xf32>
    %89 = math.exp %88 : vector<8x8xf32>
    %cst_31 = arith.constant dense<0.000000e+00> : vector<8xf32>
    %90 = vector.multi_reduction <add>, %89, %cst_31 [1] : vector<8x8xf32> to vector<8xf32>
    %91 = vector.shape_cast %90 : vector<8xf32> to vector<8x1xf32>
    %92 = tpu.reciprocal %91 {approx = true} : vector<8x1xf32> -> vector<8x1xf32>
    %93 = vector.broadcast %92 : vector<8x1xf32> to vector<8x8xf32>
    %94 = arith.mulf %89, %93 : vector<8x8xf32>
    %95 = arith.truncf %94 : vector<8x8xf32> to vector<8x8xbf16>
    %cst_32 = arith.constant dense<0.000000e+00> : vector<8x8xf32>
    %96 = tpu.matmul %95, %83, %cst_32 {dimension_numbers = #tpu.dot_dimension_numbers<[1], [0], [0], [1], [0, 0, 1, 1], [], []>} : vector<8x8xbf16>, vector<8x8xbf16>, vector<8x8xf32> -> vector<8x8xf32>
    %97 = arith.truncf %96 : vector<8x8xf32> to vector<8x8xbf16>
    %98 = vector.extract_strided_slice %45 {offsets = [0, 24], sizes = [8, 8], strides = [1, 1]} : vector<8x32xbf16> to vector<8x8xbf16>
    %99 = vector.extract_strided_slice %46 {offsets = [0, 24], sizes = [8, 8], strides = [1, 1]} : vector<8x64xbf16> to vector<8x8xbf16>
    %100 = vector.extract_strided_slice %46 {offsets = [0, 56], sizes = [8, 8], strides = [1, 1]} : vector<8x64xbf16> to vector<8x8xbf16>
    %cst_33 = arith.constant dense<0.000000e+00> : vector<8x8xf32>
    %101 = tpu.matmul %98, %99, %cst_33 {dimension_numbers = #tpu.dot_dimension_numbers<[1], [1], [0], [0], [0, 0, 1, 0], [], []>} : vector<8x8xbf16>, vector<8x8xbf16>, vector<8x8xf32> -> vector<8x8xf32>
    %cst_34 = arith.constant dense<0xFF800000> : vector<8xf32>
    %102 = vector.multi_reduction <maximumf>, %101, %cst_34 [1] : vector<8x8xf32> to vector<8xf32>
    %103 = vector.shape_cast %102 : vector<8xf32> to vector<8x1xf32>
    %104 = vector.broadcast %103 : vector<8x1xf32> to vector<8x8xf32>
    %105 = arith.subf %101, %104 : vector<8x8xf32>
    %106 = math.exp %105 : vector<8x8xf32>
    %cst_35 = arith.constant dense<0.000000e+00> : vector<8xf32>
    %107 = vector.multi_reduction <add>, %106, %cst_35 [1] : vector<8x8xf32> to vector<8xf32>
    %108 = vector.shape_cast %107 : vector<8xf32> to vector<8x1xf32>
    %109 = tpu.reciprocal %108 {approx = true} : vector<8x1xf32> -> vector<8x1xf32>
    %110 = vector.broadcast %109 : vector<8x1xf32> to vector<8x8xf32>
    %111 = arith.mulf %106, %110 : vector<8x8xf32>
    %112 = arith.truncf %111 : vector<8x8xf32> to vector<8x8xbf16>
    %cst_36 = arith.constant dense<0.000000e+00> : vector<8x8xf32>
    %113 = tpu.matmul %112, %100, %cst_36 {dimension_numbers = #tpu.dot_dimension_numbers<[1], [0], [0], [1], [0, 0, 1, 1], [], []>} : vector<8x8xbf16>, vector<8x8xbf16>, vector<8x8xf32> -> vector<8x8xf32>
    %114 = arith.truncf %113 : vector<8x8xf32> to vector<8x8xbf16>
    %115 = tpu.concatenate %63, %80, %97, %114 in 1 : vector<8x8xbf16>, vector<8x8xbf16>, vector<8x8xbf16>, vector<8x8xbf16> -> vector<8x32xbf16>
    %cst_37 = arith.constant dense<0.000000e+00> : vector<8x32xf32>
    %116 = tpu.matmul %115, %11, %cst_37 {dimension_numbers = #tpu.dot_dimension_numbers<[1], [0], [0], [1], [0, 0, 1, 1], [], []>} : vector<8x32xbf16>, vector<32x32xbf16>, vector<8x32xf32> -> vector<8x32xf32>
    %117 = vector.broadcast %27 : vector<1x32xf32> to vector<8x32xf32>
    %118 = arith.addf %116, %117 : vector<8x32xf32>
    %119 = arith.addf %34, %118 : vector<8x32xf32>
    %cst_38 = arith.constant dense<0.000000e+00> : vector<8xf32>
    %120 = vector.multi_reduction <add>, %119, %cst_38 [1] : vector<8x32xf32> to vector<8xf32>
    %121 = vector.shape_cast %120 : vector<8xf32> to vector<8x1xf32>
    %cst_39 = arith.constant 3.200000e+01 : f32
    %122 = vector.broadcast %cst_39 : f32 to vector<8x1xf32>
    %123 = arith.divf %121, %122 : vector<8x1xf32>
    %124 = vector.broadcast %123 : vector<8x1xf32> to vector<8x32xf32>
    %125 = arith.subf %119, %124 : vector<8x32xf32>
    %126 = arith.mulf %125, %125 : vector<8x32xf32>
    %cst_40 = arith.constant dense<0.000000e+00> : vector<8xf32>
    %127 = vector.multi_reduction <add>, %126, %cst_40 [1] : vector<8x32xf32> to vector<8xf32>
    %128 = vector.shape_cast %127 : vector<8xf32> to vector<8x1xf32>
    %cst_41 = arith.constant 3.200000e+01 : f32
    %129 = vector.broadcast %cst_41 : f32 to vector<8x1xf32>
    %130 = arith.divf %128, %129 : vector<8x1xf32>
    %131 = vector.broadcast %123 : vector<8x1xf32> to vector<8x32xf32>
    %132 = arith.subf %119, %131 : vector<8x32xf32>
    %cst_42 = arith.constant 9.99999974E-6 : f32
    %133 = vector.broadcast %cst_42 : f32 to vector<8x1xf32>
    %134 = arith.addf %130, %133 : vector<8x1xf32>
    %135 = math.rsqrt %134 : vector<8x1xf32>
    %136 = vector.broadcast %135 : vector<8x1xf32> to vector<8x32xf32>
    %137 = arith.mulf %132, %136 : vector<8x32xf32>
    %138 = vector.broadcast %28 : vector<1x32xf32> to vector<8x32xf32>
    %139 = arith.mulf %137, %138 : vector<8x32xf32>
    %140 = vector.broadcast %29 : vector<1x32xf32> to vector<8x32xf32>
    %141 = arith.addf %139, %140 : vector<8x32xf32>
    %142 = arith.truncf %141 : vector<8x32xf32> to vector<8x32xbf16>
    %cst_43 = arith.constant dense<0.000000e+00> : vector<8x128xf32>
    %143 = tpu.matmul %142, %14, %cst_43 {dimension_numbers = #tpu.dot_dimension_numbers<[1], [0], [0], [1], [0, 0, 1, 1], [], []>} : vector<8x32xbf16>, vector<32x128xbf16>, vector<8x128xf32> -> vector<8x128xf32>
    %144 = vector.broadcast %23 : vector<1x128xf32> to vector<8x128xf32>
    %145 = arith.addf %143, %144 : vector<8x128xf32>
    %cst_44 = arith.constant 0.000000e+00 : f32
    %146 = vector.broadcast %cst_44 : f32 to vector<8x128xf32>
    %147 = arith.maximumf %145, %146 : vector<8x128xf32>
    %148 = arith.truncf %147 : vector<8x128xf32> to vector<8x128xbf16>
    %cst_45 = arith.constant dense<0.000000e+00> : vector<8x32xf32>
    %149 = tpu.matmul %148, %17, %cst_45 {dimension_numbers = #tpu.dot_dimension_numbers<[1], [0], [0], [1], [0, 0, 1, 1], [], []>} : vector<8x128xbf16>, vector<128x32xbf16>, vector<8x32xf32> -> vector<8x32xf32>
    %150 = vector.broadcast %30 : vector<1x32xf32> to vector<8x32xf32>
    %151 = arith.addf %149, %150 : vector<8x32xf32>
    %152 = arith.addf %141, %151 : vector<8x32xf32>
    %cst_46 = arith.constant dense<0.000000e+00> : vector<8xf32>
    %153 = vector.multi_reduction <add>, %152, %cst_46 [1] : vector<8x32xf32> to vector<8xf32>
    %154 = vector.shape_cast %153 : vector<8xf32> to vector<8x1xf32>
    %cst_47 = arith.constant 3.200000e+01 : f32
    %155 = vector.broadcast %cst_47 : f32 to vector<8x1xf32>
    %156 = arith.divf %154, %155 : vector<8x1xf32>
    %157 = vector.broadcast %156 : vector<8x1xf32> to vector<8x32xf32>
    %158 = arith.subf %152, %157 : vector<8x32xf32>
    %159 = arith.mulf %158, %158 : vector<8x32xf32>
    %cst_48 = arith.constant dense<0.000000e+00> : vector<8xf32>
    %160 = vector.multi_reduction <add>, %159, %cst_48 [1] : vector<8x32xf32> to vector<8xf32>
    %161 = vector.shape_cast %160 : vector<8xf32> to vector<8x1xf32>
    %cst_49 = arith.constant 3.200000e+01 : f32
    %162 = vector.broadcast %cst_49 : f32 to vector<8x1xf32>
    %163 = arith.divf %161, %162 : vector<8x1xf32>
    %164 = vector.broadcast %156 : vector<8x1xf32> to vector<8x32xf32>
    %165 = arith.subf %152, %164 : vector<8x32xf32>
    %cst_50 = arith.constant 9.99999974E-6 : f32
    %166 = vector.broadcast %cst_50 : f32 to vector<8x1xf32>
    %167 = arith.addf %163, %166 : vector<8x1xf32>
    %168 = math.rsqrt %167 : vector<8x1xf32>
    %169 = vector.broadcast %168 : vector<8x1xf32> to vector<8x32xf32>
    %170 = arith.mulf %165, %169 : vector<8x32xf32>
    %171 = vector.broadcast %31 : vector<1x32xf32> to vector<8x32xf32>
    %172 = arith.mulf %170, %171 : vector<8x32xf32>
    %173 = vector.broadcast %32 : vector<1x32xf32> to vector<8x32xf32>
    %174 = arith.addf %172, %173 : vector<8x32xf32>
    %c0_51 = arith.constant 0 : index
    %c0_52 = arith.constant 0 : index
    %c0_53 = arith.constant 0 : index
    %175 = vector.load %arg12[%c0_51, %c0_52, %c0_53] : memref<1x8x32xf32, #tpu.memory_space<vmem>>, vector<1x8x32xf32>
    %176 = vector.shape_cast %175 : vector<1x8x32xf32> to vector<8x32xf32>
    %177 = vector.shape_cast %174 : vector<8x32xf32> to vector<1x8x32xf32>
    tpu.vector_store %arg12[%c0_51, %c0_52, %c0_53], %177 {strides = array<i32>} : memref<1x8x32xf32, #tpu.memory_space<vmem>>, vector<1x8x32xf32>,
    return
  }
  func.func @transform_0(%arg0: i32, %arg1: i32, %arg2: i32) -> (i32, i32, i32) {
    %c0_i32 = arith.constant 0 : i32
    %c0_i32_0 = arith.constant 0 : i32
    return %arg0, %arg1, %c0_i32 : i32, i32, i32
  }
  func.func @transform_1(%arg0: i32, %arg1: i32, %arg2: i32) -> (i32, i32, i32) {
    %c0_i32 = arith.constant 0 : i32
    %c0_i32_0 = arith.constant 0 : i32
    %c0_i32_1 = arith.constant 0 : i32
    return %arg0, %c0_i32, %c0_i32_0 : i32, i32, i32
  }
  func.func @transform_2(%arg0: i32, %arg1: i32, %arg2: i32) -> (i32, i32, i32) {
    %c0_i32 = arith.constant 0 : i32
    %c0_i32_0 = arith.constant 0 : i32
    %c0_i32_1 = arith.constant 0 : i32
    %c0_i32_2 = arith.constant 0 : i32
    return %c0_i32, %c0_i32_0, %c0_i32_1 : i32, i32, i32
  }
  func.func @transform_3(%arg0: i32, %arg1: i32, %arg2: i32) -> (i32, i32, i32) {
    %c0_i32 = arith.constant 0 : i32
    %c0_i32_0 = arith.constant 0 : i32
    %c0_i32_1 = arith.constant 0 : i32
    %c0_i32_2 = arith.constant 0 : i32
    return %c0_i32, %c0_i32_0, %c0_i32_1 : i32, i32, i32
  }
  func.func @transform_4(%arg0: i32, %arg1: i32, %arg2: i32) -> (i32, i32, i32) {
    %c0_i32 = arith.constant 0 : i32
    %c0_i32_0 = arith.constant 0 : i32
    %c0_i32_1 = arith.constant 0 : i32
    %c0_i32_2 = arith.constant 0 : i32
    return %c0_i32, %c0_i32_0, %c0_i32_1 : i32, i32, i32
  }
  func.func @transform_5(%arg0: i32, %arg1: i32, %arg2: i32) -> (i32, i32, i32) {
    %c0_i32 = arith.constant 0 : i32
    %c0_i32_0 = arith.constant 0 : i32
    %c0_i32_1 = arith.constant 0 : i32
    %c0_i32_2 = arith.constant 0 : i32
    return %c0_i32, %c0_i32_0, %c0_i32_1 : i32, i32, i32
  }
  func.func @transform_6(%arg0: i32, %arg1: i32, %arg2: i32) -> (i32, i32, i32) {
    %c0_i32 = arith.constant 0 : i32
    %c0_i32_0 = arith.constant 0 : i32
    %c0_i32_1 = arith.constant 0 : i32
    %c0_i32_2 = arith.constant 0 : i32
    return %c0_i32, %c0_i32_0, %c0_i32_1 : i32, i32, i32
  }
  func.func @transform_7(%arg0: i32, %arg1: i32, %arg2: i32) -> (i32, i32, i32) {
    %c0_i32 = arith.constant 0 : i32
    %c0_i32_0 = arith.constant 0 : i32
    %c0_i32_1 = arith.constant 0 : i32
    %c0_i32_2 = arith.constant 0 : i32
    return %c0_i32, %c0_i32_0, %c0_i32_1 : i32, i32, i32
  }
  func.func @transform_8(%arg0: i32, %arg1: i32, %arg2: i32) -> (i32, i32, i32) {
    %c0_i32 = arith.constant 0 : i32
    %c0_i32_0 = arith.constant 0 : i32
    %c0_i32_1 = arith.constant 0 : i32
    %c0_i32_2 = arith.constant 0 : i32
    return %c0_i32, %c0_i32_0, %c0_i32_1 : i32, i32, i32
  }
  func.func @transform_9(%arg0: i32, %arg1: i32, %arg2: i32) -> (i32, i32, i32) {
    %c0_i32 = arith.constant 0 : i32
    %c0_i32_0 = arith.constant 0 : i32
    return %arg0, %arg1, %c0_i32 : i32, i32, i32
  }
}

</mosaic_0001>

<bundles_post_ra>
// kernel: tpu_custom_call.1
= control target key start
LH: loop header
LB: loop body
LE: loop exit
PB: predicated region body
PF: predicated region fallthrough
CT: control target
= control target key end

     0   :  { %s2427_s0 = inlined_call_operand.hbm [shape: f32[2,8,32], index: 0, kind: input, shape index: {}]   ;;  %s2428_s1 = inlined_call_operand.hbm [shape: bf16[2,8,32], index: 1, kind: input, shape index: {}]   ;;  %s2429_s2 = inlined_call_operand.vmem [shape: bf16[2,32,32], index: 2, kind: input, shape index: {}]   ;;  %s2430_s3 = inlined_call_operand.vmem [shape: bf16[2,32,64], index: 3, kind: input, shape index: {}]   ;;  %s2431_s4 = inlined_call_operand.vmem [shape: bf16[2,32,32], index: 4, kind: input, shape index: {}]   ;;  %s2432_s5 = inlined_call_operand.vmem [shape: bf16[2,32,128], index: 5, kind: input, shape index: {}]   ;;  %s2433_s6 = inlined_call_operand.vmem [shape: bf16[2,128,32], index: 6, kind: input, shape index: {}]   ;;  %s2434_s7 = inlined_call_operand.vmem [shape: f32[2,16,32], index: 7, kind: input, shape index: {}]   ;;  %s2435_s8 = inlined_call_operand.vmem [shape: f32[2,1,128], index: 8, kind: input, shape index: {}]   ;;  %s2436_s9 = inlined_call_operand.hbm [shape: f32[2,8,32], index: 9, kind: output, shape index: {}]  }
   0x1   :  { %2443 = sst [smem:[#allocation17_spill]] %s2427_s0 }
   0x2   :  { %14 = vsyncpa [#allocation3], 0 }
   0x3   :  { %16 = vsyncpa [#allocation3 + $0x1], 0 }
   0x4   :  { %17 = vsyncpa [#allocation6], 0 }
   0x5   :  { %19 = vsyncpa [#allocation6 + $0x1], 0 }
   0x6   :  { %20 = vsyncpa [#allocation4], 0 }
   0x7   :  { %22 = vsyncpa [#allocation4 + $0x1], 0  ;;  %s2016_s30 = smov 0   ;;  %s2018_s10 = smov 0  }
   0x8   :  { %s2020_s11 = smov 0   ;;  %s2022_s12 = smov 0  }
   0x9   :  { %s2024_s13 = smov 0   ;;  %s2026_s14 = smov 0  }
   0xa   :  { %s2028_s15 = smov 0   ;;  %s2030_s16 = smov 0  }
   0xb LB: > { %2444 = sst [smem:[#allocation11_spill]] %s1940_s14  ;;  %s1459_s17 = sadd.s32 4294967295, %s1948_s16   ;;  %s1948_s16 = sphi %s2030_s16, %s28_s16   ;;  %s1944_s15 = sphi %s2028_s15, %s2468_s15   ;;  %s1940_s14 = sphi %s2026_s14, %s2467_s14   ;;  %s1936_s13 = sphi %s2024_s13, %s2466_s13   ;;  %s1932_s12 = sphi %s2022_s12, %s2465_s12   ;;  %s1928_s11 = sphi %s2020_s11, %s2471_s11   ;;  %s1924_s10 = sphi %s2018_s10, %s2470_s10   ;;  %s1920_s30 = sphi %s2016_s30, %s2469_s30  }
   0xc   : > { %2445 = sst [smem:[#allocation12_spill]] %s1944_s15  ;;  %s1460_s18 = sadd.s32 4294967294, %s1948_s16  }
   0xd   : > { %s40_s19 = sadd.s32 1, %s1940_s14  ;;  %s47_s20 = sadd.s32 1, %s1944_s15 }
   0xe   : > { %p41_p0 = scmp.ge.s32.totalorder %s40_s19, 2  ;;  %s56_s21 = sadd.s32 1, %s1928_s11 }
   0xf   : > { %p63_p1 = scmp.ne.s32.totalorder %s1928_s11, %s1924_s10  ;;  %p64_p2 = scmp.eq.s32.totalorder %s1948_s16, 0 }
  0x10   : > { %s2473_s19 = smov (%p41_p0, %s40_s19), 0  ;;  %s2475_s20 = smov (!%p41_p0, %s47_s20), %s1944_s15 }
  0x11   : > { %2446 = sst [smem:[#allocation13_spill]] %s2473_s19  ;;  %p2067_p3 = por %p64_p2, %p63_p1 }
  0x12   : > { %p69_p4 = scmp.ne.s32.totalorder %s1924_s10, %s1920_s30  ;;  %p49_p5 = scmp.ge.s32.totalorder %s2475_s20, 2 }
  0x13   : > { %p70_p6 = scmp.eq.s32.totalorder %s1459_s17, 0  ;;  %p268_p7 = scmp.eq.s32.totalorder %s1459_s17, 3 }
  0x14   : > { %p274_p8 = scmp.eq.s32.totalorder %s1460_s18, 3  ;;  %s2477_s20 = smov (%p49_p5, %s2475_s20), 0 }
  0x15   : > { %2448 = sst [smem:[#allocation14_spill]] %s2477_s20  ;;  %p2075_p9 = por %p70_p6, %p69_p4 }
  0x16   : > { %p2079_p10 = por %p268_p7, %p63_p1  ;;  %s51_s25 = ssub.s32 %s1944_s15, %s2477_s20 }
  0x17   : > { %s2449_s23 = scalar_select %p2075_p9, 1, 0 }
  0x18   : > { %s2450_s24 = scalar_select %p2079_p10, 1, 0 }
  0x19   : > { %p2085_p11 = por %p274_p8, %p69_p4  ;;  %p54_p12 = scmp.eq.s32.totalorder %s51_s25, 0 }
  0x1a   : > { %p1671_p13 = scmp.lt.s32.totalorder %s1948_s16, 4  ;;  %s2091_s27 = sand.u32 1, %s1928_s11  }
  0x1b   : > { %s2451_s26 = scalar_select %p2085_p11, 1, 0 }
  0x1c   : > { %s2094_s28 = scalar_select %p54_p12, %s1928_s11, %s56_s21  }
  0x1d   : > { %2452 = sst [smem:[#allocation15_spill]] %s2451_s26  ;;  %s1463_s29 = sshll.u32 %s2091_s27, 3 }
  0x1e   : > { %2453 = sst [smem:[#allocation16_spill]] %s2094_s28  ;;  %s1464_s17 = sshll.u32 %s1944_s15, 7 }
  0x1f   : > { %s2454_s0 = sld [smem:[#allocation17_spill]]  ;;  %s319_s20 = scalar_lea.vmem [#allocation2], %s1463_s29 }
  0x20   : > { %s327_s25 = sshll.u32 %s319_s20, 4  ;;  %p2107_p0 = pnand %p1671_p13, %p2067_p3  ;;  %s2103_s25 = int_to_ptr.vmem [resolvable:$true] %s327_s25 }
  0x21   : > { %s316_s19 = scalar_lea.sflag [#allocation3], %s2091_s27 }
  0x22   : > { %p1788_p5 = pneg %p2107_p0 }
  0x25   : > { %s2101_s14 = scalar_lea.hbm %s2454_s0, %s1464_s17  ;;  %s1791_s22 = scalar_lea.hbm %s2454_s0, 256 }
  0x26   : > { %s1786_s21 = scalar_lea.hbm %s2101_s14, 128  ;;  %p1792_p3 = scmp.lt.u32.totalorder %s2101_s14, %s2454_s0 }
  0x27   : > { %p1787_p4 = scmp.ne.s32.totalorder %s2101_s14, %s1786_s21  ;;  %p1793_p8 = scmp.lt.u32.totalorder %s1791_s22, %s1786_s21 }
  0x28   : > { %p1795_p13 = scmp.lt.u32.totalorder %s1786_s21, %s2101_s14 }
  0x29   : > { %p1789_p6 = pnand %p1788_p5, %p1787_p4  ;;  %p1794_p12 = por %p1793_p8, %p1792_p3 }
  0x2b   : > { %p1790_p7 = pneg %p1789_p6  ;;  %p1796_p1 = por %p1795_p13, %p1794_p12 }
  0x2d   : > { %p1797_p2 = pnand %p1796_p1, %p1790_p7 }
  0x2f   : > { %1800 = shalt.err (!%p1797_p2)
}
  0x30   : > { %s1801_s28 = scalar_lea.vmem %s2103_s25, 128  ;;  %s1950_s20 = smov [#allocation2]  }
  0x31   : > { %p1802_p4 = scmp.ne.s32.totalorder %s2103_s25, %s1801_s28  ;;  %s1806_s29 = sshll.u32 %s1950_s20, 4  ;;  %s1807_s29 = int_to_ptr.vmem [resolvable:$false] %s1806_s29 }
  0x32   : > { %s1808_s17 = scalar_lea.vmem %s1807_s29, 256  ;;  %p1809_p10 = scmp.lt.s32.totalorder %s2103_s25, %s1807_s29 }
  0x33   : > { %p1804_p6 = pnand %p1802_p4, %p1788_p5  ;;  %p1810_p3 = scmp.lt.s32.totalorder %s1808_s17, %s1801_s28 }
  0x35   : > { %p1805_p11 = pneg %p1804_p6  ;;  %p1811_p8 = por %p1810_p3, %p1809_p10 }
  0x37   : > { %p1812_p12 = pnand %p1811_p8, %p1805_p11 }
  0x39   : > { %1815 = shalt.err (!%p1812_p12)
}
  0x3a   : > { %1663 = dma.hbm_to_vmem [thread:$0]  (!%p2107_p0), %s2101_s14, 128, %s2103_s25, %s316_s19  }
  0x3b   : > { %p2456_p1 = scmp.lt.s32.totalorder %s1948_s16, 5  ;;  %p2457_p2 = scmp.ge.s32.totalorder %s1948_s16, 1 }
  0x3c   : > { %s1465_s28 = sshll.u32 %s2091_s27, 2  ;;  %s1466_s22 = sshll.u32 %s1944_s15, 6 }
  0x3d   : > { %p2143_p7 = pnand %p2457_p2, %p2456_p1  ;;  %s2152_s29 = scalar_lea.hbm %s2428_s1, %s1466_s22 }
  0x3e   : > { %s338_s17 = scalar_lea.vmem [#allocation5], %s1465_s28  ;;  %s335_s14 = scalar_lea.sflag [#allocation6], %s2091_s27 }
  0x3f   : > { %s2458_s21 = scalar_select %p2143_p7, 1, 0 }
  0x40   : > { %s345_s0 = sshll.u32 %s338_s17, 4  ;;  %s1816_s25 = scalar_lea.hbm %s2152_s29, 64  ;;  %s346_s0 = int_to_ptr.vmem [resolvable:$true] %s345_s0 }
  0x41   : > { %p1817_p10 = scmp.ne.s32.totalorder %s2152_s29, %s1816_s25  ;;  %s1821_s18 = scalar_lea.hbm %s2428_s1, 128 }
  0x42   : > { %p1822_p4 = scmp.lt.u32.totalorder %s2152_s29, %s2428_s1  ;;  %p1823_p6 = scmp.lt.u32.totalorder %s1821_s18, %s1816_s25 }
  0x43   : > { %p1819_p11 = pnand %p1817_p10, %p1788_p5  ;;  %p1825_p8 = scmp.lt.u32.totalorder %s1816_s25, %s2152_s29 }
  0x44   : > { %p1824_p3 = por %p1823_p6, %p1822_p4 }
  0x45   : > { %p1820_p13 = pneg %p1819_p11 }
  0x46   : > { %p1826_p12 = por %p1825_p8, %p1824_p3 }
  0x48   : > { %p1827_p1 = pnand %p1826_p12, %p1820_p13 }
  0x4a   : > { %1830 = shalt.err (!%p1827_p1)
}
  0x4b   : > { %s1831_s27 = scalar_lea.vmem %s346_s0, 64  ;;  %s1951_s28 = smov [#allocation5]  }
  0x4c   : > { %p1832_p2 = scmp.ne.s32.totalorder %s346_s0, %s1831_s27  ;;  %s1836_s15 = sshll.u32 %s1951_s28, 4  ;;  %s1837_s15 = int_to_ptr.vmem [resolvable:$false] %s1836_s15 }
  0x4d   : > { %s1838_s17 = scalar_lea.vmem %s1837_s15, 128  ;;  %p1839_p9 = scmp.lt.s32.totalorder %s346_s0, %s1837_s15 }
  0x4e   : > { %p1834_p10 = pnand %p1832_p2, %p1788_p5  ;;  %p1840_p7 = scmp.lt.s32.totalorder %s1838_s17, %s1831_s27 }
  0x50   : > { %p1835_p11 = pneg %p1834_p10  ;;  %p1841_p4 = por %p1840_p7, %p1839_p9 }
  0x52   : > { %p1842_p6 = pnand %p1841_p4, %p1835_p11 }
  0x54   : > { %1845 = shalt.err (!%p1842_p6)
}
  0x55   : > { %1666 = dma.hbm_to_vmem [thread:$0]  (!%p2107_p0), %s2152_s29, 64, %s346_s0, %s335_s14  }
  0x56   : > { %p2459_p13 = scmp.ne.s32.totalorder %s2458_s21, 0 }
  0x57   : > { %s2177_s25 = sand.u32 (!%p2459_p13), 1, %s1924_s10   ;;  %p2460_p5 = scmp.ne.s32.totalorder (!%p2459_p13), %s2449_s23, 0 }
  0x58   : > { %354 = sbr.rel (%p2459_p13) target bundleno = 2669 (0xa6d), region = 56  ;;  %s1468_s19 = sshll.u32 (!%p2459_p13), %s2177_s25, 3 }
  0x59   : > { %s357_s18 = scalar_lea.sflag (!%p2459_p13), [#allocation3], %s2177_s25  ;;  %s360_s22 = scalar_lea.vmem (!%p2459_p13), [#allocation2], %s1468_s19 }
  0x5f   : > { %1907 = dma.done.wait (%p2460_p5), %s357_s18, 128  }
  0x60   : > { %1909 = vsyncadd (%p2460_p5), %s357_s18, 4294967168  ;;  %s1469_s0 = sshll.u32 %s2177_s25, 2  ;;  %s366_s26 = scalar_lea.sflag [#allocation6], %s2177_s25 }
  0x61   : > { %s2187_s21 = scalar_lea.vmem [#allocation5], %s1469_s0 }
  0x62   : > { %1911 = dma.done.wait (%p2460_p5), %s366_s26, 64  }
  0x63   : > { %1913 = vsyncadd (%p2460_p5), %s366_s26, 4294967232  ;;  %s2193_s29 = scalar_lea.vmem [#allocation7], %s1468_s19  ;;  %p1471_p9 = scmp.ne.s32.totalorder %s1932_s12, 0 }
  0x64   : > { %v414_v0 = vld [vmem:[%s360_s22] sm:$0xff] (!%p1471_p9)  ;;  %vm415_vm0 = vcmask (!%p1471_p9), 261120  }
  0x65   : > { %413 = sbr.rel (%p1471_p9) target bundleno = 108 (0x6c), region = 68  ;;  %416 = vst.msk [vmem:[%s2193_s29] sm:$0xff] (!%p1471_p9), %vm415_vm0, %v414_v0 }
  0x6c PF: > { %s2198_s14 = sshll.u32 %s1932_s12, 4  ;;  %v1952_v1 = vmov 0.0   ;;  %vm1953_vm1 = vmmov 0   ;;  %v2211_v3 = vld [vmem:[%s2193_s29] sm:$0xff]  ;;  %vm485_vm2 = vcmask 261120   ;;  %s1954_s0 = smov 32   ;;  %v469_v11 = vlaneseq }
  0x6d   : > { %1554 = vmatprep.subr.bf16.mxu1 %v1952_v1  ;;  %s419_s27 = scalar_lea.vmem %s2429_s2, %s2198_s14  ;;  %1558 = vmatprep.mubr.msk.bf16.mxu1 %vm1953_vm1, %v1952_v1  ;;  %s425_s17 = scalar_lea.vmem %s2430_s3, %s2198_s14  ;;  %v468_v6 = vpack.c.bf16 %v2211_v3, %v2211_v3  ;;  %v467_v10 = vld [vmem:[%s2187_s21] sm:$0xf]  ;;  %vm596_vm3 = vcmask 64512   ;;  %vm661_vm4 = vcmask 1043456   ;;  %vm1052_vm5 = vcmask 130048  }
  0x6e   : > { %v1750_v2 = vld [vmem:[%s419_s27] sm:$0xff]   ;;  %1582 = vmatprep.subr.bf16.mxu0 %v1952_v1  ;;  %1584 = vmatprep.mubr.msk.bf16.mxu0 %vm1953_vm1, %v1952_v1  ;;  %s2221_s22 = scalar_lea.vmem %s2434_s7, %s2198_s14  ;;  %v1751_v4 = vld [vmem:[%s419_s27 + $0x8] sm:$0xff]   ;;  %v2240_v12 = vshrl.u32 %v469_v11, 7  ;;  %s1955_s26 = smov 120   ;;  %vm1055_vm6 = vcmask 195584  }
  0x6f   : > { %1555 = vmatpush3.bf16.msra.mxu1 %v1750_v2  ;;  %v2225_v5 = vld [vmem:[%s2221_s22] sm:$0xff]  ;;  %v1753_v9 = vld [vmem:[%s425_s17 + $0x8] sm:$0xff]   ;;  %s1956_s21 = smov 112   ;;  %s1957_s23 = smov 104  }
  0x70   : > { %1556 = vmatprep.subr.bf16.mxu1 %v1952_v1  ;;  %v530_v7 = vrot.slane %v2225_v5, 1  ;;  %v1752_v8 = vld [vmem:[%s425_s17] sm:$0xff]   ;;  %v471_v13 = vsub.s32 0, %v2240_v12  ;;  %v537_v19 = vsub.s32 1, %v2240_v12  ;;  %s1958_s20 = smov 88   ;;  %s1959_s27 = smov 96  }
  0x71   : > { %s1960_s28 = smov 72   ;;  %s1961_s15 = smov 80  }
  0x72   : > { %531 = vrot.lane.b32.xlu0 %v530_v7, %s1954_s0  ;;  %v472_v14 = vrot.slane %v2225_v5, %v471_v13  ;;  %s1962_s17 = smov 8   ;;  %s431_s0 = scalar_lea.vmem %s2431_s4, %s2198_s14 }
  0x73   : > { %1557 = vmatpush3.bf16.msra.mxu1 %v1751_v4  ;;  %p2461_p7 = scmp.ne.s32.totalorder %s2450_s24, 0 }
  0x74   : > { %1562 = vmatprep.subr.bf16.mxu1 %v1952_v1 }
  0x76   : > { %1559 = vmatmul.mubr.msk.bf16.vlgmr.msra.gmra.mrb[0].mxu1 %vm485_vm2, %v468_v6 }
  0x77   : > { %1563 = vmatpush3.bf16.msra.mxu1 %v1752_v8  ;;  %1566 = vmatprep.mubr.msk.bf16.mxu1 %vm1953_vm1, %v1952_v1 }
  0x78   : > { %1564 = vmatprep.subr.bf16.mxu1 %v1952_v1 }
  0x7b   : > { %1565 = vmatpush3.bf16.msra.mxu1 %v1753_v9 }
  0x7c   : > { %1570 = vmatprep.subr.bf16.mxu1 %v1952_v1 }
  0x7e   : > { %1567 = vmatmul.mubr.msk.bf16.vlgmr.msra.gmra.mrb[4].mxu1 %vm485_vm2, %v467_v10 }
  0x7f   : > { %1572 = vmatprep.mubr.msk.bf16.mxu1 %vm1953_vm1, %v1952_v1 }
  0xe4   : > { %v532_v15 = vpop.permute.xlu0 %531 }
  0xe5   : > { %v534_v21 = vsel %vm485_vm2, %v2225_v5, %v532_v15 }
  0xe6   : > { %v538_v24 = vrot.slane %v534_v21, %v537_v19 }
 0x149   : > { %v523_v16 = vpop.f32.mrb[0].mxu1 }
 0x14a   : > { %v524_v17 = vadd.f32 %v523_v16, %v472_v14  ;;  %v1560_v18 = vpop.f32.mrb[1].mxu1 }
 0x14b   : > { %v526_v20 = vpop.f32.mrb[2].mxu1 }
 0x14c   : > { %v594_v22 = vpack.c.bf16 %v524_v17, %v524_v17  ;;  %v1561_v23 = vpop.f32.mrb[3].mxu1 }
 0x14e   : > { %707 = vrot.lane.b32.xlu1 %v594_v22, %s1955_s26 }
 0x151   : > { %v588_v25 = vpop.f32.mrb[4].mxu1 }
 0x152   : > { %v589_v26 = vadd.f32 %v588_v25, %v538_v24  ;;  %v1568_v27 = vpop.f32.mrb[5].mxu1 }
 0x153   : > { %v591_v28 = vpop.f32.mrb[6].mxu1 }
 0x154   : > { %v2249_v29 = vpack.c.bf16 %v589_v26, %v589_v26  ;;  %v1569_v30 = vpop.f32.mrb[7].mxu1 }
 0x156   : > { %820 = vrot.lane.b32.xlu1 %v2249_v29, %s1956_s21  ;;  %709 = vrot.lane.b32.xlu0 %v2249_v29, %s1955_s26  ;;  %v601_v31 = vsel %vm596_vm3, %v2249_v29, 0  ;;  %s1963_s26 = smov 16  }
 0x157   : > { %1571 = vmatpush3.bf16.xpose.msra.mxu1 %v601_v31 }
 0x158   : > { %1576 = vmatprep.subr.bf16.mxu1 %v1952_v1 }
 0x15a   : > { %931 = vrot.lane.b32.xlu1 %v2249_v29, %s1957_s23  ;;  %818 = vrot.lane.b32.xlu0 %v594_v22, %s1956_s21  ;;  %s1964_s21 = smov 24  }
 0x15e   : > { %929 = vrot.lane.b32.xlu0 %v594_v22, %s1957_s23  ;;  %1573 = vmatmul.mubr.msk.bf16.vlgmr.msra.gmra.mrb[8].mxu1 %vm596_vm3, %v594_v22 }
 0x15f   : > { %1578 = vmatprep.mubr.msk.bf16.mxu1 %vm1953_vm1, %v1952_v1 }
 0x1c0   : > { %v708_v34 = vpop.permute.xlu1 %707 }
 0x1c8   : > { %v710_v32 = vpop.permute.xlu0 %709  ;;  %v821_v35 = vpop.permute.xlu1 %820 }
 0x1c9   : > { %v715_v33 = vsel %vm596_vm3, %v710_v32, 0  ;;  %v826_v36 = vsel %vm596_vm3, %v821_v35, 0 }
 0x1ca   : > { %1583 = vmatpush3.bf16.xpose.msra.mxu0 %v715_v33 }
 0x1cb   : > { %1594 = vmatprep.subr.bf16.mxu0 %v1952_v1 }
 0x1cc   : > { %v932_v37 = vpop.permute.xlu1 %931  ;;  %v819_v38 = vpop.permute.xlu0 %818 }
 0x1cd   : > { %v937_v39 = vsel %vm596_vm3, %v932_v37, 0 }
 0x1d0   : > { %v930_v40 = vpop.permute.xlu0 %929 }
 0x1d1   : > { %1585 = vmatmul.mubr.msk.bf16.vlgmr.msra.gmra.mrb[0].mxu0 %vm596_vm3, %v708_v34 }
 0x1d2   : > { %1595 = vmatpush3.bf16.xpose.msra.mxu0 %v826_v36  ;;  %1596 = vmatprep.mubr.msk.bf16.mxu0 %vm1953_vm1, %v1952_v1 }
 0x1d3   : > { %1606 = vmatprep.subr.bf16.mxu0 %v1952_v1 }
 0x1d9   : > { %1597 = vmatmul.mubr.msk.bf16.vlgmr.msra.gmra.mrb[4].mxu0 %vm596_vm3, %v819_v38 }
 0x1da   : > { %1607 = vmatpush3.bf16.xpose.msra.mxu0 %v937_v39  ;;  %1608 = vmatprep.mubr.msk.bf16.mxu0 %vm1953_vm1, %v1952_v1 }
 0x1db   : > { %1618 = vmatprep.subr.bf16.mxu0 %v1952_v1 }
 0x1e1   : > { %1609 = vmatmul.mubr.msk.bf16.vlgmr.msra.gmra.mrb[8].mxu0 %vm596_vm3, %v930_v40 }
 0x1e2   : > { %1622 = vmatprep.mubr.msk.bf16.mxu0 %vm1953_vm1, %v1952_v1 }
 0x231   : > { %v637_v41 = vpop.f32.mrb[8].mxu1 }
 0x232   : > { %v1574_v42 = vpop.f32.mrb[9].mxu1  ;;  %v643_v43 = vsel %vm596_vm3, %v637_v41, -inf }
 0x233   : > { %644 = vmax.xlane.f32.xlu1 %v643_v43  ;;  %v640_v44 = vpop.f32.mrb[10].mxu1 }
 0x234   : > { %v1575_v45 = vpop.f32.mrb[11].mxu1 }
 0x2a4   : > { %v751_v46 = vpop.f32.mrb[0].mxu0 }
 0x2a5   : > { %v1586_v47 = vpop.f32.mrb[1].mxu0  ;;  %v757_v48 = vsel %vm596_vm3, %v751_v46, -inf }
 0x2a6   : > { %758 = vmax.xlane.f32.xlu0 %v757_v48  ;;  %v754_v49 = vpop.f32.mrb[2].mxu0 }
 0x2a7   : > { %v1587_v50 = vpop.f32.mrb[3].mxu0 }
 0x2ac   : > { %v862_v51 = vpop.f32.mrb[4].mxu0 }
 0x2ad   : > { %v1598_v52 = vpop.f32.mrb[5].mxu0  ;;  %v868_v53 = vsel %vm596_vm3, %v862_v51, -inf }
 0x2ae   : > { %869 = vmax.xlane.f32.xlu0 %v868_v53  ;;  %v865_v54 = vpop.f32.mrb[6].mxu0 }
 0x2af   : > { %v1599_v55 = vpop.f32.mrb[7].mxu0 }
 0x2b0   : > { %v1754_v55 = vld [vmem:[%s431_s0] sm:$0xff]  }
 0x2b1   : > { %1619 = vmatpush3.bf16.msra.mxu0 %v1754_v55 }
 0x2b2   : > { %1620 = vmatprep.subr.bf16.mxu0 %v1952_v1 }
 0x2b4   : > { %v973_v56 = vpop.f32.mrb[8].mxu0 }
 0x2b5   : > { %v1610_v57 = vpop.f32.mrb[9].mxu0  ;;  %v979_v58 = vsel %vm596_vm3, %v973_v56, -inf }
 0x2b6   : > { %v976_v59 = vpop.f32.mrb[10].mxu0  ;;  %980 = vmax.xlane.f32.xlu1 %v979_v58 }
 0x2b7   : > { %v1611_v60 = vpop.f32.mrb[11].mxu0 }
 0x2c0   : > { %v645_v61 = vpop.xlane.xlu1 %644 }
 0x2c1   : > { %v646_v62 = vsub.f32 %v637_v41, %v645_v61 }
 0x2c3   : > { %v647_v63 = vmul.f32 1.442695, %v646_v62 }
 0x2c5   : > { %1766 = vpow2.f32 %v647_v63 }
 0x2cf   : > { %v1767_v0 = vpop.eup %1766 }
 0x2d0   : > { %v649_v2 = vsel %vm596_vm3, %v1767_v0, 0.0 }
 0x2d1   : > { %650 = vadd.xlane.f32.xlu0 %v649_v2 }
 0x333   : > { %v759_v4 = vpop.xlane.xlu0 %758 }
 0x334   : > { %v760_v6 = vsub.f32 %v751_v46, %v759_v4 }
 0x336   : > { %v761_v7 = vmul.f32 1.442695, %v760_v6 }
 0x338   : > { %1768 = vpow2.f32 %v761_v7 }
 0x33b   : > { %v870_v8 = vpop.xlane.xlu0 %869 }
 0x33c   : > { %v871_v9 = vsub.f32 %v862_v51, %v870_v8 }
 0x33e   : > { %v872_v10 = vmul.f32 1.442695, %v871_v9 }
 0x340   : > { %1770 = vpow2.f32 %v872_v10 }
 0x342   : > { %v1769_v11 = vpop.eup %1768 }
 0x343   : > { %v763_v14 = vsel %vm596_vm3, %v1769_v11, 0.0  ;;  %v981_v17 = vpop.xlane.xlu1 %980 }
 0x344   : > { %764 = vadd.xlane.f32.xlu1 %v763_v14  ;;  %v982_v18 = vsub.f32 %v973_v56, %v981_v17  ;;  %v1755_v56 = vld [vmem:[%s431_s0 + $0x8] sm:$0xff]   ;;  %s464_s0 = scalar_lea.vmem %s2435_s8, %s1932_s12 }
 0x345   : > { %1621 = vmatpush3.bf16.msra.mxu0 %v1755_v56 }
 0x346   : > { %v983_v19 = vmul.f32 1.442695, %v982_v18  ;;  %1634 = vmatprep.subr.bf16.mxu0 %v1952_v1 }
 0x348   : > { %1772 = vpow2.f32 %v983_v19 }
 0x34a   : > { %v1771_v15 = vpop.eup %1770 }
 0x34b   : > { %v874_v16 = vsel %vm596_vm3, %v1771_v15, 0.0 }
 0x34c   : > { %875 = vadd.xlane.f32.xlu0 %v874_v16 }
 0x352   : > { %v1773_v20 = vpop.eup %1772 }
 0x353   : > { %v985_v21 = vsel %vm596_vm3, %v1773_v20, 0.0 }
 0x355   : > { %769 = vrot.lane.b32.xlu1 %v2249_v29, %s1958_s20 }
 0x35e   : > { %v651_v22 = vpop.xlane.xlu0 %650 }
 0x35f   : > { %1774 = vrcp.f32 %v651_v22 }
 0x362   : > { %656 = vrot.lane.b32.xlu0 %v2249_v29, %s1959_s27  ;;  %s437_s27 = scalar_lea.vmem %s2432_s5, %s2198_s14 }
 0x366   : > { %991 = vrot.lane.b32.xlu0 %v2249_v29, %s1960_s28  ;;  %s1516_s28 = sshll.u32 %s1932_s12, 6  ;;  %s1509_s12 = sshll.u32 %s1936_s13, 7 }
 0x367   : > { %s2331_s19 = scalar_lea.vmem %s2433_s6, %s1516_s28  ;;  %s2371_s20 = scalar_lea.hbm %s2436_s9, %s1509_s12 }
 0x368   : > { %s1965_s13 = smov [#allocation7]  }
 0x369   : > { %v1775_v24 = vpop.eup %1774  ;;  %s1850_s28 = sshll.u32 %s1965_s13, 4  ;;  %s1851_s28 = int_to_ptr.vmem [resolvable:$false] %s1850_s28 }
 0x36a   : > { %v653_v26 = vmul.f32 %v1775_v24, %v1767_v0 }
 0x36c   : > { %v654_v31 = vpack.c.bf16 %v653_v26, %v653_v26 }
 0x379   : > { %986 = vadd.xlane.f32.xlu1 %v985_v21 }
 0x38a   : > { %880 = vrot.lane.b32.xlu1 %v2249_v29, %s1961_s15  ;;  %s1852_s15 = scalar_lea.vmem %s1851_s28, 256 }
 0x3d1   : > { %v765_v23 = vpop.xlane.xlu1 %764 }
 0x3d2   : > { %1776 = vrcp.f32 %v765_v23 }
 0x3d5   : > { %v770_v30 = vpop.permute.xlu1 %769 }
 0x3d6   : > { %v775_v33 = vsel %vm661_vm4, %v770_v30, 0  ;;  %v1756_v30 = vld [vmem:[%s437_s27] sm:$0xff]  }
 0x3d9   : > { %v876_v25 = vpop.xlane.xlu0 %875 }
 0x3da   : > { %1778 = vrcp.f32 %v876_v25 }
 0x3dc   : > { %v1777_v32 = vpop.eup %1776 }
 0x3dd   : > { %v657_v27 = vpop.permute.xlu0 %656  ;;  %v767_v29 = vmul.f32 %v1777_v32, %v1769_v11  ;;  %v1759_v32 = vld [vmem:[%s2331_s19 + $0x8] sm:$0xff]  }
 0x3de   : > { %v663_v28 = vsel %vm661_vm4, %v657_v27, 0 }
 0x3df   : > { %1577 = vmatpush3.bf16.msra.mxu1 %v663_v28  ;;  %v768_v34 = vpack.c.bf16 %v767_v29, %v767_v29  ;;  %v1761_v29 = vld [vmem:[%s2331_s19 + $0x18] sm:$0xff]  }
 0x3e0   : > { %1588 = vmatprep.subr.bf16.mxu1 %v1952_v1 }
 0x3e1   : > { %v992_v40 = vpop.permute.xlu0 %991 }
 0x3e2   : > { %1579 = vmatmul.mubr.msk.bf16.vlgmr.msra.gmra.mrb[12].mxu1 %vm596_vm3, %v654_v31  ;;  %v997_v42 = vsel %vm661_vm4, %v992_v40, 0  ;;  %v1757_v31 = vld [vmem:[%s437_s27 + $0x8] sm:$0xff]   ;;  %v1138_v40 = vsub.s32 5, %v2240_v12 }
 0x3e3   : > { %1589 = vmatpush3.bf16.msra.mxu1 %v775_v33  ;;  %1590 = vmatprep.mubr.msk.bf16.mxu1 %vm1953_vm1, %v1952_v1  ;;  %v1760_v33 = vld [vmem:[%s2331_s19 + $0x10] sm:$0xff]  }
 0x3e4   : > { %1600 = vmatprep.subr.bf16.mxu1 %v1952_v1  ;;  %v1779_v35 = vpop.eup %1778 }
 0x3e5   : > { %v878_v37 = vmul.f32 %v1779_v35, %v1771_v15  ;;  %v1060_v15 = vsub.s32 3, %v2240_v12  ;;  %v1763_v35 = vld [vmem:[%s2331_s19 + $0x28] sm:$0xff]  }
 0x3e7   : > { %v879_v41 = vpack.c.bf16 %v878_v37, %v878_v37  ;;  %v1061_v16 = vrot.slane %v2225_v5, %v1060_v15  ;;  %v1313_v15 = vsub.s32 7, %v2240_v12 }
 0x3ea   : > { %1591 = vmatmul.mubr.msk.bf16.vlgmr.msra.gmra.mrb[16].mxu1 %vm596_vm3, %v768_v34  ;;  %v1762_v34 = vld [vmem:[%s2331_s19 + $0x20] sm:$0xff]  }
 0x3eb   : > { %1602 = vmatprep.mubr.msk.bf16.mxu1 %vm1953_vm1, %v1952_v1 }
 0x406   : > { %v987_v36 = vpop.xlane.xlu1 %986 }
 0x407   : > { %1780 = vrcp.f32 %v987_v36 }
 0x40a   : > { %v881_v38 = vpop.permute.xlu1 %880 }
 0x40b   : > { %v886_v39 = vsel %vm661_vm4, %v881_v38, 0 }
 0x40c   : > { %1601 = vmatpush3.bf16.msra.mxu1 %v886_v39  ;;  %v1133_v39 = vsub.s32 4, %v2240_v12 }
 0x40d   : > { %1612 = vmatprep.subr.bf16.mxu1 %v1952_v1 }
 0x40f   : > { %1603 = vmatmul.mubr.msk.bf16.vlgmr.msra.gmra.mrb[20].mxu1 %vm596_vm3, %v879_v41  ;;  %v1134_v41 = vrot.slane %v2225_v5, %v1133_v39 }
 0x410   : > { %1613 = vmatpush3.bf16.msra.mxu1 %v997_v42  ;;  %1614 = vmatprep.mubr.msk.bf16.mxu1 %vm1953_vm1, %v1952_v1 }
 0x411   : > { %v1781_v43 = vpop.eup %1780  ;;  %1626 = vmatprep.subr.bf16.mxu1 %v1952_v1 }
 0x412   : > { %v989_v44 = vmul.f32 %v1781_v43, %v1773_v20 }
 0x414   : > { %v990_v45 = vpack.c.bf16 %v989_v44, %v989_v44  ;;  %v1139_v44 = vrot.slane %v2225_v5, %v1138_v40 }
 0x417   : > { %1615 = vmatmul.mubr.msk.bf16.vlgmr.msra.gmra.mrb[24].mxu1 %vm596_vm3, %v990_v45 }
 0x418   : > { %1630 = vmatprep.mubr.msk.bf16.mxu1 %vm1953_vm1, %v1952_v1  ;;  %1627 = vmatpush3.bf16.msra.mxu1 %v1756_v30 }
 0x419   : > { %1628 = vmatprep.subr.bf16.mxu1 %v1952_v1 }
 0x41c   : > { %1629 = vmatpush3.bf16.msra.mxu1 %v1757_v31 }
 0x4b5   : > { %v699_v46 = vpop.f32.mrb[12].mxu1 }
 0x4b6   : > { %v1580_v47 = vpop.f32.mrb[13].mxu1  ;;  %v705_v7 = vpack.c.bf16 %v699_v46, %v699_v46 }
 0x4b7   : > { %v702_v48 = vpop.f32.mrb[14].mxu1 }
 0x4b8   : > { %v1581_v49 = vpop.f32.mrb[15].mxu1  ;;  %v1764_v48 = vld [vmem:[%s2331_s19 + $0x30] sm:$0xff]  }
 0x4b9   : > { %v1765_v49 = vld [vmem:[%s2331_s19 + $0x38] sm:$0xff]  }
 0x4bd   : > { %v811_v50 = vpop.f32.mrb[16].mxu1 }
 0x4be   : > { %v817_v51 = vpack.c.bf16 %v811_v50, %v811_v50  ;;  %v1592_v52 = vpop.f32.mrb[17].mxu1  ;;  %v1496_v50 = vld [vmem:[%s464_s0] ss:$0 sm:$0xff] }
 0x4bf   : > { %v814_v53 = vpop.f32.mrb[18].mxu1 }
 0x4c0   : > { %1041 = vrot.lane.b32.xlu1 %v817_v51, %s1962_s17  ;;  %v1593_v54 = vpop.f32.mrb[19].mxu1 }
 0x4e2   : > { %v922_v57 = vpop.f32.mrb[20].mxu1 }
 0x4e3   : > { %v928_v58 = vpack.c.bf16 %v922_v57, %v922_v57  ;;  %v1604_v59 = vpop.f32.mrb[21].mxu1 }
 0x4e4   : > { %v925_v60 = vpop.f32.mrb[22].mxu1 }
 0x4e5   : > { %1044 = vrot.lane.b32.xlu0 %v928_v58, %s1963_s26  ;;  %v1605_v61 = vpop.f32.mrb[23].mxu1  ;;  %v1207_v58 = vsub.s32 6, %v2240_v12  ;;  %s1337_s26 = sshll.u32 %s2193_s29, 4  ;;  %s2373_s26 = int_to_ptr.vmem [resolvable:$true] %s1337_s26 }
 0x4e6   : > { %s1846_s27 = scalar_lea.vmem %s2373_s26, 128  ;;  %p1853_p12 = scmp.lt.s32.totalorder %s2373_s26, %s1851_s28 }
 0x4e7   : > { %v1208_v59 = vrot.slane %v2225_v5, %v1207_v58  ;;  %p1847_p0 = scmp.ne.s32.totalorder %s2373_s26, %s1846_s27  ;;  %p1854_p1 = scmp.lt.s32.totalorder %s1852_s15, %s1846_s27 }
 0x4e9   : > { %p1848_p3 = pnand %p1847_p0, %p2461_p7  ;;  %p1855_p2 = por %p1854_p1, %p1853_p12 }
 0x4ea   : > { %v1033_v62 = vpop.f32.mrb[24].mxu1 }
 0x4eb   : > { %v1039_v63 = vpack.c.bf16 %v1033_v62, %v1033_v62  ;;  %v1616_v0 = vpop.f32.mrb[25].mxu1  ;;  %p1849_p8 = pneg %p1848_p3 }
 0x4ec   : > { %v1036_v2 = vpop.f32.mrb[26].mxu1 }
 0x4ed   : > { %1047 = vrot.lane.b32.xlu1 %v1039_v63, %s1964_s21  ;;  %v1617_v4 = vpop.f32.mrb[27].mxu1  ;;  %p1856_p10 = pnand %p1855_p2, %p1849_p8 }
 0x532   : > { %v1042_v6 = vpop.permute.xlu1 %1041 }
 0x533   : > { %v1051_v9 = vsel %vm596_vm3, %v705_v7, %v1042_v6 }
 0x557   : > { %v1045_v8 = vpop.permute.xlu0 %1044 }
 0x558   : > { %v1054_v10 = vsel %vm1052_vm5, %v1051_v9, %v1045_v8 }
 0x55f   : > { %v1048_v11 = vpop.permute.xlu1 %1047 }
 0x560   : > { %v1057_v14 = vsel %vm1055_vm6, %v1054_v10, %v1048_v11 }
 0x561   : > { %1623 = vmatmul.mubr.msk.bf16.vlgmr.msra.gmra.mrb[12].mxu0 %vm485_vm2, %v1057_v14 }
 0x562   : > { %1650 = vmatprep.mubr.msk.bf16.mxu0 %vm1953_vm1, %v1952_v1 }
 0x634   : > { %v1110_v17 = vpop.f32.mrb[12].mxu0 }
 0x635   : > { %v1111_v18 = vadd.f32 %v1110_v17, %v1061_v16  ;;  %v1624_v19 = vpop.f32.mrb[13].mxu0  ;;  %v463_v16 = vld [vmem:[%s2221_s22 + $0x8] sm:$0xff]  ;;  %v1314_v17 = vrot.slane %v2225_v5, %v1313_v15  ;;  %s1323_s22 = scalar_lea.sflag [#allocation4], %s2177_s25 }
 0x636   : > { %v1113_v20 = vpop.f32.mrb[14].mxu0  ;;  %v1319_v19 = vrot.slane %v463_v16, %v471_v13 }
 0x637   : > { %v1625_v21 = vpop.f32.mrb[15].mxu0  ;;  %v1116_v22 = vadd.f32 %v1111_v18, %v2211_v3  ;;  %v1758_v3 = vld [vmem:[%s2331_s19] sm:$0xff]  }
 0x638   : > { %1635 = vmatpush3.bf16.msra.mxu0 %v1758_v3 }
 0x639   : > { %v1117_v23 = vsel %vm485_vm2, %v1116_v22, 0.0  ;;  %1636 = vmatprep.subr.bf16.mxu0 %v1952_v1 }
 0x63a   : > { %1118 = vadd.xlane.f32.xlu0 %v1117_v23 }
 0x63c   : > { %1637 = vmatpush3.bf16.msra.mxu0 %v1759_v32 }
 0x63d   : > { %1638 = vmatprep.subr.bf16.mxu0 %v1952_v1 }
 0x640   : > { %1639 = vmatpush3.bf16.msra.mxu0 %v1760_v33 }
 0x641   : > { %1640 = vmatprep.subr.bf16.mxu0 %v1952_v1 }
 0x644   : > { %1641 = vmatpush3.bf16.msra.mxu0 %v1761_v29 }
 0x645   : > { %1642 = vmatprep.subr.bf16.mxu0 %v1952_v1 }
 0x648   : > { %1643 = vmatpush3.bf16.msra.mxu0 %v1762_v34 }
 0x649   : > { %1644 = vmatprep.subr.bf16.mxu0 %v1952_v1 }
 0x64c   : > { %1645 = vmatpush3.bf16.msra.mxu0 %v1763_v35 }
 0x64d   : > { %1646 = vmatprep.subr.bf16.mxu0 %v1952_v1 }
 0x650   : > { %1647 = vmatpush3.bf16.msra.mxu0 %v1764_v48 }
 0x651   : > { %1648 = vmatprep.subr.bf16.mxu0 %v1952_v1 }
 0x654   : > { %1649 = vmatpush3.bf16.msra.mxu0 %v1765_v49 }
 0x6c7   : > { %v1119_v24 = vpop.xlane.xlu0 %1118 }
 0x6c8   : > { %v1121_v25 = vmul.f32 0.03125, %v1119_v24 }
 0x6ca   : > { %v1122_v26 = vsub.f32 %v1116_v22, %v1121_v25 }
 0x6cc   : > { %v1123_v27 = vmul.f32 %v1122_v26, %v1122_v26 }
 0x6ce   : > { %v1124_v28 = vsel %vm485_vm2, %v1123_v27, 0.0 }
 0x6cf   : > { %1125 = vadd.xlane.f32.xlu1 %v1124_v28 }
 0x75c   : > { %v1126_v36 = vpop.xlane.xlu1 %1125 }
 0x75d   : > { %v1127_v37 = vmul.f32 0.03125, %v1126_v36 }
 0x75f   : > { %v1128_v38 = vadd.f32 1e-05, %v1127_v37 }
 0x761   : > { %1782 = vrsqrt.f32 %v1128_v38 }
 0x76b   : > { %v1783_v42 = vpop.eup %1782 }
 0x76c   : > { %v1130_v43 = vmul.f32 %v1783_v42, %v1122_v26 }
 0x76e   : > { %v1135_v45 = vmul.f32 %v1134_v41, %v1130_v43 }
 0x770   : > { %v1140_v46 = vadd.f32 %v1139_v44, %v1135_v45 }
 0x772   : > { %v1141_v47 = vpack.c.bf16 %v1140_v46, %v1140_v46 }
 0x774   : > { %1631 = vmatmul.mubr.msk.bf16.vlgmr.msra.gmra.mrb[28].mxu1 %vm485_vm2, %v1141_v47 }
 0x847   : > { %v1197_v51 = vpop.f32.mrb[28].mxu1 }
 0x848   : > { %v1198_v52 = vadd.f32 %v1496_v50, %v1197_v51  ;;  %v1632_v53 = vpop.f32.mrb[29].mxu1 }
 0x849   : > { %v1200_v54 = vpop.f32.mrb[30].mxu1 }
 0x84a   : > { %v1203_v55 = vmax.f32 %v1198_v52, 0.0  ;;  %v1633_v56 = vpop.f32.mrb[31].mxu1 }
 0x84c   : > { %v1204_v57 = vpack.c.bf16 %v1203_v55, %v1203_v55 }
 0x84e   : > { %1651 = vmatmul.mubr.bf16.vlgmr.msra.gmra.mrb[16].mxu0 %v1204_v57 }
 0x921   : > { %v1291_v1 = vpop.f32.mrb[16].mxu0 }
 0x922   : > { %v1292_v60 = vadd.f32 %v1291_v1, %v1208_v59  ;;  %v1652_v61 = vpop.f32.mrb[17].mxu0 }
 0x923   : > { %v1294_v62 = vpop.f32.mrb[18].mxu0 }
 0x924   : > { %v1653_v63 = vpop.f32.mrb[19].mxu0  ;;  %v1297_v0 = vadd.f32 %v1292_v60, %v1140_v46 }
 0x926   : > { %v1298_v2 = vsel %vm485_vm2, %v1297_v0, 0.0 }
 0x927   : > { %1299 = vadd.xlane.f32.xlu0 %v1298_v2 }
 0x9b4   : > { %v1300_v4 = vpop.xlane.xlu0 %1299 }
 0x9b5   : > { %v1301_v6 = vmul.f32 0.03125, %v1300_v4 }
 0x9b7   : > { %v1302_v7 = vsub.f32 %v1297_v0, %v1301_v6 }
 0x9b9   : > { %v1303_v8 = vmul.f32 %v1302_v7, %v1302_v7 }
 0x9bb   : > { %v1304_v9 = vsel %vm485_vm2, %v1303_v8, 0.0 }
 0x9bc   : > { %1305 = vadd.xlane.f32.xlu0 %v1304_v9 }
 0xa49   : > { %v1306_v10 = vpop.xlane.xlu0 %1305 }
 0xa4a   : > { %v1307_v11 = vmul.f32 0.03125, %v1306_v10 }
 0xa4c   : > { %v1308_v14 = vadd.f32 1e-05, %v1307_v11 }
 0xa4e   : > { %1784 = vrsqrt.f32 %v1308_v14 }
 0xa58   : > { %v1785_v18 = vpop.eup %1784 }
 0xa59   : > { %v1310_v20 = vmul.f32 %v1785_v18, %v1302_v7 }
 0xa5b   : > { %v1315_v21 = vmul.f32 %v1314_v17, %v1310_v20 }
 0xa5d   : > { %v1320_v22 = vadd.f32 %v1319_v19, %v1315_v21 }
 0xa5f   : > { %1321 = vst.msk [vmem:[%s2193_s29] sm:$0xff] %vm485_vm2, %v1320_v22 }
 0xa60   : > { %1859 = shalt.err (!%p1856_p10)
}
 0xa61   : > { %s1860_s25 = scalar_lea.hbm %s2371_s20, 128  ;;  %s1864_s19 = scalar_lea.hbm %s2436_s9, 256 }
 0xa62   : > { %p1861_p11 = scmp.ne.s32.totalorder %s2371_s20, %s1860_s25  ;;  %p1865_p13 = scmp.lt.u32.totalorder %s2371_s20, %s2436_s9 }
 0xa63   : > { %p1866_p5 = scmp.lt.u32.totalorder %s1864_s19, %s1860_s25  ;;  %p1868_p0 = scmp.lt.u32.totalorder %s1860_s25, %s2371_s20 }
 0xa64   : > { %p1862_p4 = pnand %p1861_p11, %p2461_p7 }
 0xa65   : > { %p1867_p9 = por %p1866_p5, %p1865_p13 }
 0xa66   : > { %p1863_p6 = pneg %p1862_p4 }
 0xa67   : > { %p1869_p3 = por %p1868_p0, %p1867_p9 }
 0xa69   : > { %p1870_p8 = pnand %p1869_p3, %p1863_p6 }
 0xa6b   : > { %1873 = shalt.err (!%p1870_p8)
}
 0xa6c   : > { %1658 = dma.vmem_to_hbm [thread:$0]  (%p2461_p7), %s2373_s26, 128, %s2371_s20, %s1323_s22  }
 0xa6d PF: > { %s2462_s0 = sld [smem:[#allocation15_spill]]  ;;  %p1672_p12 = scmp.ge.s32.totalorder %s1948_s16, 2 }
 0xa6e   : > { %s1349_s12 = sand.u32 1, %s1920_s30  }
 0xa6f   : > { %s1350_s21 = scalar_lea.sflag [#allocation4], %s1349_s12 }
 0xa73   : > { %p2463_p1 = scmp.ne.s32.totalorder %s2462_s0, 0 }
 0xa75   : > { %p1668_p2 = pnand %p1672_p12, %p2463_p1 }
 0xa77   : > { %1915 = dma.done.wait (!%p1668_p2), %s1350_s21, 128  }
 0xa78   : > { %1917 = vsyncadd (!%p1668_p2), %s1350_s21, 4294967168  ;;  %s28_s16 = sadd.s32 1, %s1948_s16   ;;  %s2464_s24 = sld [smem:[#allocation16_spill]] }
 0xa79   : > { %p25_p10 = scmp.ge.s32.totalorder %s28_s16, 6   ;;  %s2465_s12 = sld [smem:[#allocation11_spill]] }
 0xa7a   : > { %s2466_s13 = sld [smem:[#allocation12_spill]]  ;;  %s2467_s14 = sld [smem:[#allocation13_spill]] }
 0xa7b   : > { %s2468_s15 = sld [smem:[#allocation14_spill]]  ;;  %s2469_s30 = smov %s1924_s10 }
 0xa7c   : > { %s2470_s10 = smov %s1928_s11  ;;  %27 = sbr.rel (!%p25_p10) target bundleno = 11 (0xb), region = 125 }
 0xa7e   : > { %s2471_s11 = smov %s2464_s24 }
 0xa83   :  { %1355 = vsyncpa [#allocation3], 1 }
 0xa84   :  { %1357 = vsyncpa [#allocation3 + $0x1], 1 }
 0xa85   :  { %1358 = vsyncpa [#allocation6], 1 }
 0xa86   :  { %1360 = vsyncpa [#allocation6 + $0x1], 1 }
 0xa87   :  { %1361 = vsyncpa [#allocation4], 1 }
 0xa88   :  { %1363 = vsyncpa [#allocation4 + $0x1], 1 }

</bundles_post_ra>
